<compile_context>
chip_gen: v6e
topology: v6e:2x2x1
jax: 0.10.0
libtpu: 0.0.40
codegen_flags: <defaults>
</compile_context>

<pallas_src>
import functools

import jax
import jax.numpy as jnp
from jax.experimental import pallas as pl
from jax.experimental.pallas import tpu as pltpu

LANE = 128                      # TPU lane width; output channel pad target
DEFAULT_TM = 512                # rows per grid step (~85% HBM roofline on v6e)
VMEM_LIMIT = 32 * 1024 * 1024   # explicit scoped-VMEM limit (safe on v5e..v7x)


def _round_up(x, m):
    return ((x + m - 1) // m) * m


# ----------------------------------------------------------------------------
# Kernel 1: conv-as-matmul, fused bias + optional ReLU
# ----------------------------------------------------------------------------
def _conv_kernel(x_ref, w_ref, b_ref, o_ref, *, relu_out):
    acc = jnp.dot(x_ref[...], w_ref[...], preferred_element_type=jnp.float32)
    acc = acc + b_ref[...]                       # bias (1, Nout), f32
    if relu_out:
        acc = jnp.maximum(acc, 0.0)
    o_ref[...] = acc.astype(o_ref.dtype)


def conv_matmul(patches, w, b, *, relu_out=False, tm=DEFAULT_TM):
    """patches: [M, K] bf16; w: [K, Npad] bf16; b: [1, Npad] f32 -> [M, Npad] bf16."""
    M, K = patches.shape
    K2, N = w.shape
    assert K == K2, (K, K2)

    TM = min(tm, _round_up(M, 8))
    Mp = _round_up(M, TM)
    if Mp != M:
        patches = jnp.pad(patches, ((0, Mp - M), (0, 0)))

    out = pl.pallas_call(
        functools.partial(_conv_kernel, relu_out=relu_out),
        out_shape=jax.ShapeDtypeStruct((Mp, N), patches.dtype),
        grid=(Mp // TM,),
        in_specs=[
            pl.BlockSpec((TM, K), lambda i: (i, 0)),   # tiled over M
            pl.BlockSpec((K, N), lambda i: (0, 0)),    # weights resident
            pl.BlockSpec((1, N), lambda i: (0, 0)),    # bias resident
        ],
        out_specs=pl.BlockSpec((TM, N), lambda i: (i, 0)),
        compiler_params=pltpu.CompilerParams(
            dimension_semantics=("parallel",),
            vmem_limit_bytes=VMEM_LIMIT),
    )(patches, w, b)
    return out[:M] if Mp != M else out


# ----------------------------------------------------------------------------
# Kernel 2: fully fused ResBlock
#   out = [ReLU]( relu( relu(patches) @ W1 + b1 ) @ W2 + b2 + x )
# Pre-ReLU, 3x3 conv, mid-ReLU, 1x1 conv, bias, residual add and optional
# trailing ReLU all happen in one kernel; the [TM, Rpad] intermediate never
# touches HBM.
# ----------------------------------------------------------------------------
def _resblock_kernel(p_ref, w1_ref, b1_ref, w2_ref, b2_ref, r_ref, o_ref,
                     *, relu_post):
    # Pre-activation ReLU fused in-kernel (commutes with im2col: border pads
    # and row pads are zero, relu(0) == 0).
    p = jnp.maximum(p_ref[...], 0).astype(w1_ref.dtype)
    t = jnp.dot(p, w1_ref[...], preferred_element_type=jnp.float32)
    t = jnp.maximum(t + b1_ref[...], 0.0)                       # 3x3 + ReLU
    acc = jnp.dot(t.astype(w2_ref.dtype), w2_ref[...],
                  preferred_element_type=jnp.float32)           # 1x1
    acc = acc + b2_ref[...] + r_ref[...].astype(jnp.float32)    # + residual
    if relu_post:                                               # trailing ReLU
        acc = jnp.maximum(acc, 0.0)
    o_ref[...] = acc.astype(o_ref.dtype)


def resblock_fused(patches, w1, b1, w2, b2, resid, *, relu_post,
                   tm=DEFAULT_TM):
    M, K = patches.shape
    Rp = w1.shape[1]
    Cp = w2.shape[1]
    assert resid.shape == (M, Cp), (resid.shape, M, Cp)

    TM = min(tm, _round_up(M, 8))
    Mp = _round_up(M, TM)
    if Mp != M:
        patches = jnp.pad(patches, ((0, Mp - M), (0, 0)))
        resid = jnp.pad(resid, ((0, Mp - M), (0, 0)))

    out = pl.pallas_call(
        functools.partial(_resblock_kernel, relu_post=relu_post),
        out_shape=jax.ShapeDtypeStruct((Mp, Cp), patches.dtype),
        grid=(Mp // TM,),
        in_specs=[
            pl.BlockSpec((TM, K), lambda i: (i, 0)),   # patches tile
            pl.BlockSpec((K, Rp), lambda i: (0, 0)),   # W1 resident
            pl.BlockSpec((1, Rp), lambda i: (0, 0)),   # b1 resident
            pl.BlockSpec((Rp, Cp), lambda i: (0, 0)),  # W2 resident
            pl.BlockSpec((1, Cp), lambda i: (0, 0)),   # b2 resident
            pl.BlockSpec((TM, Cp), lambda i: (i, 0)),  # residual tile
        ],
        out_specs=pl.BlockSpec((TM, Cp), lambda i: (i, 0)),
        compiler_params=pltpu.CompilerParams(
            dimension_semantics=("parallel",),
            vmem_limit_bytes=VMEM_LIMIT),
    )(patches, w1, b1, w2, b2, resid)
    return out[:M] if Mp != M else out


# ----------------------------------------------------------------------------
# Plain-JAX glue: im2col patch extraction (static kernel/stride/pad)
# ----------------------------------------------------------------------------
def im2col(x_nhwc, kh, kw, stride, pad):
    N, H, W, C = x_nhwc.shape
    xp = jnp.pad(x_nhwc, ((0, 0), (pad, pad), (pad, pad), (0, 0)))
    Ho = (H + 2 * pad - kh) // stride + 1
    Wo = (W + 2 * pad - kw) // stride + 1
    cols = []
    for i in range(kh):
        for j in range(kw):
            cols.append(xp[:, i:i + Ho * stride:stride,
                           j:j + Wo * stride:stride, :])
    patches = jnp.stack(cols, axis=3)             # [N, Ho, Wo, kh*kw, C]
    patches = patches.reshape(N * Ho * Wo, kh * kw * C)
    return patches, (N, Ho, Wo)


# ----------------------------------------------------------------------------
# Parameters (PyTorch-style fan-in uniform init), pre-reshaped to matmul form
# with zero-padded output columns (lane-dense stores) and, for the 1x1 conv,
# zero-padded input rows (its input is the lane-padded intermediate).
# ----------------------------------------------------------------------------
def _conv_params(key, cin, cout, k, *, cout_pad, rows_pad=None):
    kw_, kb_ = jax.random.split(key)
    fan_in = cin * k * k
    bound = float(1.0 / (fan_in ** 0.5))
    w_oihw = jax.random.uniform(kw_, (cout, cin, k, k), jnp.float32,
                                -bound, bound)
    b = jax.random.uniform(kb_, (cout,), jnp.float32, -bound, bound)
    # OIHW -> (kh, kw, Cin, Cout) -> [kh*kw*Cin, Cout] matches im2col order.
    w_mat = jnp.transpose(w_oihw, (2, 3, 1, 0)).reshape(k * k * cin, cout)
    rows = k * k * cin if rows_pad is None else rows_pad
    w_mat = jnp.pad(w_mat, ((0, rows - k * k * cin), (0, cout_pad - cout)))
    b_row = jnp.pad(b, (0, cout_pad - cout)).reshape(1, cout_pad)
    return w_mat.astype(jnp.bfloat16), b_row.astype(jnp.float32)


def init_encoder_params(key, in_channel, channel, n_res_block, n_res_channel,
                        stride):
    half = channel // 2
    cpad = _round_up(channel, LANE)
    hpad = _round_up(half, LANE)
    rpad = _round_up(n_res_channel, LANE)

    keys = jax.random.split(key, 3 + 2 * max(n_res_block, 1))
    params = {}
    if stride == 4:
        params['w1'], params['b1'] = _conv_params(keys[0], in_channel, half, 4,
                                                  cout_pad=hpad)
        params['w2'], params['b2'] = _conv_params(keys[1], half, channel, 4,
                                                  cout_pad=cpad)
        params['w3'], params['b3'] = _conv_params(keys[2], channel, channel, 3,
                                                  cout_pad=cpad)
    elif stride == 2:
        params['w1'], params['b1'] = _conv_params(keys[0], in_channel, half, 4,
                                                  cout_pad=hpad)
        params['w2'], params['b2'] = _conv_params(keys[1], half, channel, 3,
                                                  cout_pad=cpad)
    else:
        raise ValueError("stride must be 2 or 4")

    res = []
    for i in range(n_res_block):
        w1, b1 = _conv_params(keys[3 + 2 * i], channel, n_res_channel, 3,
                              cout_pad=rpad)
        w2, b2 = _conv_params(keys[4 + 2 * i], n_res_channel, channel, 1,
                              cout_pad=cpad, rows_pad=rpad)
        res.append({'w1': w1, 'b1': b1, 'w2': w2, 'b2': b2})
    params['res'] = res
    return params


# ----------------------------------------------------------------------------
# Encoder forward (matches nn.Sequential semantics of the PyTorch module)
# ----------------------------------------------------------------------------
def encoder_forward(params, x_nchw, *, stride, channel):
    half = channel // 2
    x = jnp.transpose(x_nchw, (0, 2, 3, 1)).astype(jnp.bfloat16)  # NCHW->NHWC

    # Conv(in, channel//2, 4, s=2, p=1) + ReLU   (output lane-padded)
    p, (N, Ho, Wo) = im2col(x, 4, 4, 2, 1)
    h = conv_matmul(p, params['w1'], params['b1'], relu_out=True)
    h = h.reshape(N, Ho, Wo, -1)

    n_res = len(params['res'])
    if stride == 4:
        # Conv(channel//2, channel, 4, s=2, p=1) + ReLU
        p, (N, Ho, Wo) = im2col(h[..., :half], 4, 4, 2, 1)
        h = conv_matmul(p, params['w2'], params['b2'], relu_out=True)
        h = h.reshape(N, Ho, Wo, -1)
        # Conv(channel, channel, 3, p=1); trailing encoder ReLU only if no res
        p, (N, Ho, Wo) = im2col(h[..., :channel], 3, 3, 1, 1)
        h = conv_matmul(p, params['w3'], params['b3'], relu_out=(n_res == 0))
        h = h.reshape(N, Ho, Wo, -1)
    else:  # stride == 2
        p, (N, Ho, Wo) = im2col(h[..., :half], 3, 3, 1, 1)
        h = conv_matmul(p, params['w2'], params['b2'], relu_out=(n_res == 0))
        h = h.reshape(N, Ho, Wo, -1)

    cpad = h.shape[-1]
    # ResBlocks: x + Conv1x1(ReLU(Conv3x3(ReLU(x)))).  The pre-ReLU, both
    # convs, the residual add and (for the last block) the trailing encoder
    # ReLU are all fused inside ONE pallas_call per block.
    for i, rp in enumerate(params['res']):
        last = (i == n_res - 1)
        p3, _ = im2col(h[..., :channel], 3, 3, 1, 1)
        out = resblock_fused(p3, rp['w1'], rp['b1'], rp['w2'], rp['b2'],
                             h.reshape(-1, cpad), relu_post=last)
        h = out.reshape(N, Ho, Wo, cpad)

    out = h[..., :channel].astype(jnp.float32)        # drop lane padding
    return jnp.transpose(out, (0, 3, 1, 2))           # NHWC -> NCHW


# ----------------------------------------------------------------------------
# Pure-JAX reference (uses the same bf16-quantized weights, f32 activations)
# ----------------------------------------------------------------------------
def _ref_conv(x, w_mat, b_row, cin, cout, k, stride, pad):
    w = w_mat[:k * k * cin, :cout].astype(jnp.float32).reshape(k, k, cin, cout)
    b = b_row[0, :cout].astype(jnp.float32)
    y = jax.lax.conv_general_dilated(
        x, w, window_strides=(stride, stride),
        padding=[(pad, pad), (pad, pad)],
        dimension_numbers=('NHWC', 'HWIO', 'NHWC'))
    return y + b


def encoder_reference(params, x_nchw, *, stride, channel, in_channel,
                      n_res_channel):
    half = channel // 2
    x = jnp.transpose(x_nchw, (0, 2, 3, 1)).astype(jnp.float32)
    h = jax.nn.relu(_ref_conv(x, params['w1'], params['b1'],
                              in_channel, half, 4, 2, 1))
    if stride == 4:
        h = jax.nn.relu(_ref_conv(h, params['w2'], params['b2'],
                                  half, channel, 4, 2, 1))
        h = _ref_conv(h, params['w3'], params['b3'], channel, channel, 3, 1, 1)
    else:
        h = _ref_conv(h, params['w2'], params['b2'], half, channel, 3, 1, 1)
    for rp in params['res']:
        t = jax.nn.relu(h)
        t = jax.nn.relu(_ref_conv(t, rp['w1'], rp['b1'],
                                  channel, n_res_channel, 3, 1, 1))
        t = _ref_conv(t, rp['w2'], rp['b2'], n_res_channel, channel, 1, 1, 0)
        h = h + t
    h = jax.nn.relu(h)
    return jnp.transpose(h, (0, 3, 1, 2))


# ----------------------------------------------------------------------------
if __name__ == "__main__":
    in_channel, channel = 4, 32
    n_res_block, n_res_channel, stride = 2, 8, 4

    key = jax.random.PRNGKey(0)
    pkey, xkey = jax.random.split(key)
    params = init_encoder_params(pkey, in_channel, channel, n_res_block,
                                 n_res_channel, stride)
    x = jax.random.normal(xkey, (2, in_channel, 16, 16), jnp.float32)

    fwd = jax.jit(functools.partial(encoder_forward, stride=stride,
                                    channel=channel))
    out = jax.block_until_ready(fwd(params, x))

    assert out.shape == (2, channel, 4, 4), out.shape
    assert bool(jnp.all(jnp.isfinite(out)))
    # Trailing ReLU => all outputs non-negative.
    assert bool(jnp.all(out >= 0.0))

    # Numerical check against an f32 lax.conv reference (bf16 activations in
    # the kernel path => loose tolerance).
    ref = jax.block_until_ready(
        encoder_reference(params, x, stride=stride, channel=channel,
                          in_channel=in_channel, n_res_channel=n_res_channel))
    max_err = float(jnp.max(jnp.abs(out - ref)))
    assert max_err < 0.1, f"max abs error vs reference: {max_err}"

    print("KERNEL_OK")
</pallas_src>

<mosaic_0001>
module attributes {stable_mosaic.version = 11 : i64} {
  func.func @_conv_kernel(%arg0: i32, %arg1: memref<128x64xbf16, #tpu.memory_space<vmem>>, %arg2: memref<64x128xbf16, #tpu.memory_space<vmem>>, %arg3: memref<1x128xf32, #tpu.memory_space<vmem>>, %arg4: memref<128x128xbf16, #tpu.memory_space<vmem>>) attributes {dimension_semantics = [#tpu.dimension_semantics<parallel>], iteration_bounds = array<i64: 1>, scalar_prefetch = 0 : i64, scratch_operands = 0 : i64, tpu.core_type = #tpu.core_type<tc>, window_params = [{transform_indices = @transform_0, window_bounds = array<i64: 128, 64>}, {pipeline_mode = #tpu.pipeline_mode<synchronous>, transform_indices = @transform_1, window_bounds = array<i64: 64, 128>}, {pipeline_mode = #tpu.pipeline_mode<synchronous>, transform_indices = @transform_2, window_bounds = array<i64: 1, 128>}, {transform_indices = @transform_3, window_bounds = array<i64: 128, 128>}]} {
    %c0 = arith.constant 0 : index
    %c0_0 = arith.constant 0 : index
    %0 = vector.load %arg1[%c0, %c0_0] : memref<128x64xbf16, #tpu.memory_space<vmem>>, vector<128x64xbf16>
    %c0_1 = arith.constant 0 : index
    %c0_2 = arith.constant 0 : index
    %1 = vector.load %arg2[%c0_1, %c0_2] : memref<64x128xbf16, #tpu.memory_space<vmem>>, vector<64x128xbf16>
    %cst = arith.constant dense<0.000000e+00> : vector<128x128xf32>
    %2 = tpu.matmul %0, %1, %cst {dimension_numbers = #tpu.dot_dimension_numbers<[1], [0], [0], [1], [0, 0, 1, 1], [], []>} : vector<128x64xbf16>, vector<64x128xbf16>, vector<128x128xf32> -> vector<128x128xf32>
    %c0_3 = arith.constant 0 : index
    %c0_4 = arith.constant 0 : index
    %3 = vector.load %arg3[%c0_3, %c0_4] : memref<1x128xf32, #tpu.memory_space<vmem>>, vector<1x128xf32>
    %4 = vector.broadcast %3 : vector<1x128xf32> to vector<128x128xf32>
    %5 = arith.addf %2, %4 : vector<128x128xf32>
    %cst_5 = arith.constant 0.000000e+00 : f32
    %6 = vector.broadcast %cst_5 : f32 to vector<128x128xf32>
    %7 = arith.maximumf %5, %6 : vector<128x128xf32>
    %8 = arith.truncf %7 : vector<128x128xf32> to vector<128x128xbf16>
    %c0_6 = arith.constant 0 : index
    %c0_7 = arith.constant 0 : index
    %9 = vector.load %arg4[%c0_6, %c0_7] : memref<128x128xbf16, #tpu.memory_space<vmem>>, vector<128x128xbf16>
    tpu.vector_store %arg4[%c0_6, %c0_7], %8 {strides = array<i32>} : memref<128x128xbf16, #tpu.memory_space<vmem>>, vector<128x128xbf16>,
    return
  }
  func.func @transform_0(%arg0: i32) -> (i32, i32) {
    %c0_i32 = arith.constant 0 : i32
    %c0_i32_0 = arith.constant 0 : i32
    return %arg0, %c0_i32 : i32, i32
  }
  func.func @transform_1(%arg0: i32) -> (i32, i32) {
    %c0_i32 = arith.constant 0 : i32
    %c0_i32_0 = arith.constant 0 : i32
    %c0_i32_1 = arith.constant 0 : i32
    return %c0_i32, %c0_i32_0 : i32, i32
  }
  func.func @transform_2(%arg0: i32) -> (i32, i32) {
    %c0_i32 = arith.constant 0 : i32
    %c0_i32_0 = arith.constant 0 : i32
    %c0_i32_1 = arith.constant 0 : i32
    return %c0_i32, %c0_i32_0 : i32, i32
  }
  func.func @transform_3(%arg0: i32) -> (i32, i32) {
    %c0_i32 = arith.constant 0 : i32
    %c0_i32_0 = arith.constant 0 : i32
    return %arg0, %c0_i32 : i32, i32
  }
}

module attributes {stable_mosaic.version = 11 : i64} {
  func.func @_conv_kernel(%arg0: i32, %arg1: memref<32x256xbf16, #tpu.memory_space<vmem>>, %arg2: memref<256x128xbf16, #tpu.memory_space<vmem>>, %arg3: memref<1x128xf32, #tpu.memory_space<vmem>>, %arg4: memref<32x128xbf16, #tpu.memory_space<vmem>>) attributes {dimension_semantics = [#tpu.dimension_semantics<parallel>], iteration_bounds = array<i64: 1>, scalar_prefetch = 0 : i64, scratch_operands = 0 : i64, tpu.core_type = #tpu.core_type<tc>, window_params = [{transform_indices = @transform_0, window_bounds = array<i64: 32, 256>}, {pipeline_mode = #tpu.pipeline_mode<synchronous>, transform_indices = @transform_1, window_bounds = array<i64: 256, 128>}, {pipeline_mode = #tpu.pipeline_mode<synchronous>, transform_indices = @transform_2, window_bounds = array<i64: 1, 128>}, {transform_indices = @transform_3, window_bounds = array<i64: 32, 128>}]} {
    %c0 = arith.constant 0 : index
    %c0_0 = arith.constant 0 : index
    %0 = vector.load %arg1[%c0, %c0_0] : memref<32x256xbf16, #tpu.memory_space<vmem>>, vector<32x256xbf16>
    %c0_1 = arith.constant 0 : index
    %c0_2 = arith.constant 0 : index
    %1 = vector.load %arg2[%c0_1, %c0_2] : memref<256x128xbf16, #tpu.memory_space<vmem>>, vector<256x128xbf16>
    %cst = arith.constant dense<0.000000e+00> : vector<32x128xf32>
    %2 = tpu.matmul %0, %1, %cst {dimension_numbers = #tpu.dot_dimension_numbers<[1], [0], [0], [1], [0, 0, 1, 1], [], []>} : vector<32x256xbf16>, vector<256x128xbf16>, vector<32x128xf32> -> vector<32x128xf32>
    %c0_3 = arith.constant 0 : index
    %c0_4 = arith.constant 0 : index
    %3 = vector.load %arg3[%c0_3, %c0_4] : memref<1x128xf32, #tpu.memory_space<vmem>>, vector<1x128xf32>
    %4 = vector.broadcast %3 : vector<1x128xf32> to vector<32x128xf32>
    %5 = arith.addf %2, %4 : vector<32x128xf32>
    %cst_5 = arith.constant 0.000000e+00 : f32
    %6 = vector.broadcast %cst_5 : f32 to vector<32x128xf32>
    %7 = arith.maximumf %5, %6 : vector<32x128xf32>
    %8 = arith.truncf %7 : vector<32x128xf32> to vector<32x128xbf16>
    %c0_6 = arith.constant 0 : index
    %c0_7 = arith.constant 0 : index
    %9 = vector.load %arg4[%c0_6, %c0_7] : memref<32x128xbf16, #tpu.memory_space<vmem>>, vector<32x128xbf16>
    tpu.vector_store %arg4[%c0_6, %c0_7], %8 {strides = array<i32>} : memref<32x128xbf16, #tpu.memory_space<vmem>>, vector<32x128xbf16>,
    return
  }
  func.func @transform_0(%arg0: i32) -> (i32, i32) {
    %c0_i32 = arith.constant 0 : i32
    %c0_i32_0 = arith.constant 0 : i32
    return %arg0, %c0_i32 : i32, i32
  }
  func.func @transform_1(%arg0: i32) -> (i32, i32) {
    %c0_i32 = arith.constant 0 : i32
    %c0_i32_0 = arith.constant 0 : i32
    %c0_i32_1 = arith.constant 0 : i32
    return %c0_i32, %c0_i32_0 : i32, i32
  }
  func.func @transform_2(%arg0: i32) -> (i32, i32) {
    %c0_i32 = arith.constant 0 : i32
    %c0_i32_0 = arith.constant 0 : i32
    %c0_i32_1 = arith.constant 0 : i32
    return %c0_i32, %c0_i32_0 : i32, i32
  }
  func.func @transform_3(%arg0: i32) -> (i32, i32) {
    %c0_i32 = arith.constant 0 : i32
    %c0_i32_0 = arith.constant 0 : i32
    return %arg0, %c0_i32 : i32, i32
  }
}

module attributes {stable_mosaic.version = 11 : i64} {
  func.func @_conv_kernel(%arg0: i32, %arg1: memref<32x288xbf16, #tpu.memory_space<vmem>>, %arg2: memref<288x128xbf16, #tpu.memory_space<vmem>>, %arg3: memref<1x128xf32, #tpu.memory_space<vmem>>, %arg4: memref<32x128xbf16, #tpu.memory_space<vmem>>) attributes {dimension_semantics = [#tpu.dimension_semantics<parallel>], iteration_bounds = array<i64: 1>, scalar_prefetch = 0 : i64, scratch_operands = 0 : i64, tpu.core_type = #tpu.core_type<tc>, window_params = [{transform_indices = @transform_0, window_bounds = array<i64: 32, 288>}, {pipeline_mode = #tpu.pipeline_mode<synchronous>, transform_indices = @transform_1, window_bounds = array<i64: 288, 128>}, {pipeline_mode = #tpu.pipeline_mode<synchronous>, transform_indices = @transform_2, window_bounds = array<i64: 1, 128>}, {transform_indices = @transform_3, window_bounds = array<i64: 32, 128>}]} {
    %c0 = arith.constant 0 : index
    %c0_0 = arith.constant 0 : index
    %0 = vector.load %arg1[%c0, %c0_0] : memref<32x288xbf16, #tpu.memory_space<vmem>>, vector<32x288xbf16>
    %c0_1 = arith.constant 0 : index
    %c0_2 = arith.constant 0 : index
    %1 = vector.load %arg2[%c0_1, %c0_2] : memref<288x128xbf16, #tpu.memory_space<vmem>>, vector<288x128xbf16>
    %cst = arith.constant dense<0.000000e+00> : vector<32x128xf32>
    %2 = tpu.matmul %0, %1, %cst {dimension_numbers = #tpu.dot_dimension_numbers<[1], [0], [0], [1], [0, 0, 1, 1], [], []>} : vector<32x288xbf16>, vector<288x128xbf16>, vector<32x128xf32> -> vector<32x128xf32>
    %c0_3 = arith.constant 0 : index
    %c0_4 = arith.constant 0 : index
    %3 = vector.load %arg3[%c0_3, %c0_4] : memref<1x128xf32, #tpu.memory_space<vmem>>, vector<1x128xf32>
    %4 = vector.broadcast %3 : vector<1x128xf32> to vector<32x128xf32>
    %5 = arith.addf %2, %4 : vector<32x128xf32>
    %6 = arith.truncf %5 : vector<32x128xf32> to vector<32x128xbf16>
    %c0_5 = arith.constant 0 : index
    %c0_6 = arith.constant 0 : index
    %7 = vector.load %arg4[%c0_5, %c0_6] : memref<32x128xbf16, #tpu.memory_space<vmem>>, vector<32x128xbf16>
    tpu.vector_store %arg4[%c0_5, %c0_6], %6 {strides = array<i32>} : memref<32x128xbf16, #tpu.memory_space<vmem>>, vector<32x128xbf16>,
    return
  }
  func.func @transform_0(%arg0: i32) -> (i32, i32) {
    %c0_i32 = arith.constant 0 : i32
    %c0_i32_0 = arith.constant 0 : i32
    return %arg0, %c0_i32 : i32, i32
  }
  func.func @transform_1(%arg0: i32) -> (i32, i32) {
    %c0_i32 = arith.constant 0 : i32
    %c0_i32_0 = arith.constant 0 : i32
    %c0_i32_1 = arith.constant 0 : i32
    return %c0_i32, %c0_i32_0 : i32, i32
  }
  func.func @transform_2(%arg0: i32) -> (i32, i32) {
    %c0_i32 = arith.constant 0 : i32
    %c0_i32_0 = arith.constant 0 : i32
    %c0_i32_1 = arith.constant 0 : i32
    return %c0_i32, %c0_i32_0 : i32, i32
  }
  func.func @transform_3(%arg0: i32) -> (i32, i32) {
    %c0_i32 = arith.constant 0 : i32
    %c0_i32_0 = arith.constant 0 : i32
    return %arg0, %c0_i32 : i32, i32
  }
}

module attributes {stable_mosaic.version = 11 : i64} {
  func.func @_resblock_kernel(%arg0: i32, %arg1: memref<32x288xbf16, #tpu.memory_space<vmem>>, %arg2: memref<288x128xbf16, #tpu.memory_space<vmem>>, %arg3: memref<1x128xf32, #tpu.memory_space<vmem>>, %arg4: memref<128x128xbf16, #tpu.memory_space<vmem>>, %arg5: memref<1x128xf32, #tpu.memory_space<vmem>>, %arg6: memref<32x128xbf16, #tpu.memory_space<vmem>>, %arg7: memref<32x128xbf16, #tpu.memory_space<vmem>>) attributes {dimension_semantics = [#tpu.dimension_semantics<parallel>], iteration_bounds = array<i64: 1>, scalar_prefetch = 0 : i64, scratch_operands = 0 : i64, tpu.core_type = #tpu.core_type<tc>, window_params = [{transform_indices = @transform_0, window_bounds = array<i64: 32, 288>}, {pipeline_mode = #tpu.pipeline_mode<synchronous>, transform_indices = @transform_1, window_bounds = array<i64: 288, 128>}, {pipeline_mode = #tpu.pipeline_mode<synchronous>, transform_indices = @transform_2, window_bounds = array<i64: 1, 128>}, {pipeline_mode = #tpu.pipeline_mode<synchronous>, transform_indices = @transform_3, window_bounds = array<i64: 128, 128>}, {pipeline_mode = #tpu.pipeline_mode<synchronous>, transform_indices = @transform_4, window_bounds = array<i64: 1, 128>}, {transform_indices = @transform_5, window_bounds = array<i64: 32, 128>}, {transform_indices = @transform_6, window_bounds = array<i64: 32, 128>}]} {
    %c0 = arith.constant 0 : index
    %c0_0 = arith.constant 0 : index
    %0 = vector.load %arg1[%c0, %c0_0] : memref<32x288xbf16, #tpu.memory_space<vmem>>, vector<32x288xbf16>
    %cst = arith.constant 0.000000e+00 : bf16
    %1 = vector.broadcast %cst : bf16 to vector<32x288xbf16>
    %2 = arith.maximumf %0, %1 : vector<32x288xbf16>
    %c0_1 = arith.constant 0 : index
    %c0_2 = arith.constant 0 : index
    %3 = vector.load %arg2[%c0_1, %c0_2] : memref<288x128xbf16, #tpu.memory_space<vmem>>, vector<288x128xbf16>
    %cst_3 = arith.constant dense<0.000000e+00> : vector<32x128xf32>
    %4 = tpu.matmul %2, %3, %cst_3 {dimension_numbers = #tpu.dot_dimension_numbers<[1], [0], [0], [1], [0, 0, 1, 1], [], []>} : vector<32x288xbf16>, vector<288x128xbf16>, vector<32x128xf32> -> vector<32x128xf32>
    %c0_4 = arith.constant 0 : index
    %c0_5 = arith.constant 0 : index
    %5 = vector.load %arg3[%c0_4, %c0_5] : memref<1x128xf32, #tpu.memory_space<vmem>>, vector<1x128xf32>
    %6 = vector.broadcast %5 : vector<1x128xf32> to vector<32x128xf32>
    %7 = arith.addf %4, %6 : vector<32x128xf32>
    %cst_6 = arith.constant 0.000000e+00 : f32
    %8 = vector.broadcast %cst_6 : f32 to vector<32x128xf32>
    %9 = arith.maximumf %7, %8 : vector<32x128xf32>
    %10 = arith.truncf %9 : vector<32x128xf32> to vector<32x128xbf16>
    %c0_7 = arith.constant 0 : index
    %c0_8 = arith.constant 0 : index
    %11 = vector.load %arg4[%c0_7, %c0_8] : memref<128x128xbf16, #tpu.memory_space<vmem>>, vector<128x128xbf16>
    %cst_9 = arith.constant dense<0.000000e+00> : vector<32x128xf32>
    %12 = tpu.matmul %10, %11, %cst_9 {dimension_numbers = #tpu.dot_dimension_numbers<[1], [0], [0], [1], [0, 0, 1, 1], [], []>} : vector<32x128xbf16>, vector<128x128xbf16>, vector<32x128xf32> -> vector<32x128xf32>
    %c0_10 = arith.constant 0 : index
    %c0_11 = arith.constant 0 : index
    %13 = vector.load %arg5[%c0_10, %c0_11] : memref<1x128xf32, #tpu.memory_space<vmem>>, vector<1x128xf32>
    %14 = vector.broadcast %13 : vector<1x128xf32> to vector<32x128xf32>
    %15 = arith.addf %12, %14 : vector<32x128xf32>
    %c0_12 = arith.constant 0 : index
    %c0_13 = arith.constant 0 : index
    %16 = vector.load %arg6[%c0_12, %c0_13] : memref<32x128xbf16, #tpu.memory_space<vmem>>, vector<32x128xbf16>
    %17 = arith.extf %16 : vector<32x128xbf16> to vector<32x128xf32>
    %18 = arith.addf %15, %17 : vector<32x128xf32>
    %cst_14 = arith.constant 0.000000e+00 : f32
    %19 = vector.broadcast %cst_14 : f32 to vector<32x128xf32>
    %20 = arith.maximumf %18, %19 : vector<32x128xf32>
    %21 = arith.truncf %20 : vector<32x128xf32> to vector<32x128xbf16>
    %c0_15 = arith.constant 0 : index
    %c0_16 = arith.constant 0 : index
    %22 = vector.load %arg7[%c0_15, %c0_16] : memref<32x128xbf16, #tpu.memory_space<vmem>>, vector<32x128xbf16>
    tpu.vector_store %arg7[%c0_15, %c0_16], %21 {strides = array<i32>} : memref<32x128xbf16, #tpu.memory_space<vmem>>, vector<32x128xbf16>,
    return
  }
  func.func @transform_0(%arg0: i32) -> (i32, i32) {
    %c0_i32 = arith.constant 0 : i32
    %c0_i32_0 = arith.constant 0 : i32
    return %arg0, %c0_i32 : i32, i32
  }
  func.func @transform_1(%arg0: i32) -> (i32, i32) {
    %c0_i32 = arith.constant 0 : i32
    %c0_i32_0 = arith.constant 0 : i32
    %c0_i32_1 = arith.constant 0 : i32
    return %c0_i32, %c0_i32_0 : i32, i32
  }
  func.func @transform_2(%arg0: i32) -> (i32, i32) {
    %c0_i32 = arith.constant 0 : i32
    %c0_i32_0 = arith.constant 0 : i32
    %c0_i32_1 = arith.constant 0 : i32
    return %c0_i32, %c0_i32_0 : i32, i32
  }
  func.func @transform_3(%arg0: i32) -> (i32, i32) {
    %c0_i32 = arith.constant 0 : i32
    %c0_i32_0 = arith.constant 0 : i32
    %c0_i32_1 = arith.constant 0 : i32
    return %c0_i32, %c0_i32_0 : i32, i32
  }
  func.func @transform_4(%arg0: i32) -> (i32, i32) {
    %c0_i32 = arith.constant 0 : i32
    %c0_i32_0 = arith.constant 0 : i32
    %c0_i32_1 = arith.constant 0 : i32
    return %c0_i32, %c0_i32_0 : i32, i32
  }
  func.func @transform_5(%arg0: i32) -> (i32, i32) {
    %c0_i32 = arith.constant 0 : i32
    %c0_i32_0 = arith.constant 0 : i32
    return %arg0, %c0_i32 : i32, i32
  }
  func.func @transform_6(%arg0: i32) -> (i32, i32) {
    %c0_i32 = arith.constant 0 : i32
    %c0_i32_0 = arith.constant 0 : i32
    return %arg0, %c0_i32 : i32, i32
  }
}

module attributes {stable_mosaic.version = 11 : i64} {
  func.func @_resblock_kernel(%arg0: i32, %arg1: memref<32x288xbf16, #tpu.memory_space<vmem>>, %arg2: memref<288x128xbf16, #tpu.memory_space<vmem>>, %arg3: memref<1x128xf32, #tpu.memory_space<vmem>>, %arg4: memref<128x128xbf16, #tpu.memory_space<vmem>>, %arg5: memref<1x128xf32, #tpu.memory_space<vmem>>, %arg6: memref<32x128xbf16, #tpu.memory_space<vmem>>, %arg7: memref<32x128xbf16, #tpu.memory_space<vmem>>) attributes {dimension_semantics = [#tpu.dimension_semantics<parallel>], iteration_bounds = array<i64: 1>, scalar_prefetch = 0 : i64, scratch_operands = 0 : i64, tpu.core_type = #tpu.core_type<tc>, window_params = [{transform_indices = @transform_0, window_bounds = array<i64: 32, 288>}, {pipeline_mode = #tpu.pipeline_mode<synchronous>, transform_indices = @transform_1, window_bounds = array<i64: 288, 128>}, {pipeline_mode = #tpu.pipeline_mode<synchronous>, transform_indices = @transform_2, window_bounds = array<i64: 1, 128>}, {pipeline_mode = #tpu.pipeline_mode<synchronous>, transform_indices = @transform_3, window_bounds = array<i64: 128, 128>}, {pipeline_mode = #tpu.pipeline_mode<synchronous>, transform_indices = @transform_4, window_bounds = array<i64: 1, 128>}, {transform_indices = @transform_5, window_bounds = array<i64: 32, 128>}, {transform_indices = @transform_6, window_bounds = array<i64: 32, 128>}]} {
    %c0 = arith.constant 0 : index
    %c0_0 = arith.constant 0 : index
    %0 = vector.load %arg1[%c0, %c0_0] : memref<32x288xbf16, #tpu.memory_space<vmem>>, vector<32x288xbf16>
    %cst = arith.constant 0.000000e+00 : bf16
    %1 = vector.broadcast %cst : bf16 to vector<32x288xbf16>
    %2 = arith.maximumf %0, %1 : vector<32x288xbf16>
    %c0_1 = arith.constant 0 : index
    %c0_2 = arith.constant 0 : index
    %3 = vector.load %arg2[%c0_1, %c0_2] : memref<288x128xbf16, #tpu.memory_space<vmem>>, vector<288x128xbf16>
    %cst_3 = arith.constant dense<0.000000e+00> : vector<32x128xf32>
    %4 = tpu.matmul %2, %3, %cst_3 {dimension_numbers = #tpu.dot_dimension_numbers<[1], [0], [0], [1], [0, 0, 1, 1], [], []>} : vector<32x288xbf16>, vector<288x128xbf16>, vector<32x128xf32> -> vector<32x128xf32>
    %c0_4 = arith.constant 0 : index
    %c0_5 = arith.constant 0 : index
    %5 = vector.load %arg3[%c0_4, %c0_5] : memref<1x128xf32, #tpu.memory_space<vmem>>, vector<1x128xf32>
    %6 = vector.broadcast %5 : vector<1x128xf32> to vector<32x128xf32>
    %7 = arith.addf %4, %6 : vector<32x128xf32>
    %cst_6 = arith.constant 0.000000e+00 : f32
    %8 = vector.broadcast %cst_6 : f32 to vector<32x128xf32>
    %9 = arith.maximumf %7, %8 : vector<32x128xf32>
    %10 = arith.truncf %9 : vector<32x128xf32> to vector<32x128xbf16>
    %c0_7 = arith.constant 0 : index
    %c0_8 = arith.constant 0 : index
    %11 = vector.load %arg4[%c0_7, %c0_8] : memref<128x128xbf16, #tpu.memory_space<vmem>>, vector<128x128xbf16>
    %cst_9 = arith.constant dense<0.000000e+00> : vector<32x128xf32>
    %12 = tpu.matmul %10, %11, %cst_9 {dimension_numbers = #tpu.dot_dimension_numbers<[1], [0], [0], [1], [0, 0, 1, 1], [], []>} : vector<32x128xbf16>, vector<128x128xbf16>, vector<32x128xf32> -> vector<32x128xf32>
    %c0_10 = arith.constant 0 : index
    %c0_11 = arith.constant 0 : index
    %13 = vector.load %arg5[%c0_10, %c0_11] : memref<1x128xf32, #tpu.memory_space<vmem>>, vector<1x128xf32>
    %14 = vector.broadcast %13 : vector<1x128xf32> to vector<32x128xf32>
    %15 = arith.addf %12, %14 : vector<32x128xf32>
    %c0_12 = arith.constant 0 : index
    %c0_13 = arith.constant 0 : index
    %16 = vector.load %arg6[%c0_12, %c0_13] : memref<32x128xbf16, #tpu.memory_space<vmem>>, vector<32x128xbf16>
    %17 = arith.extf %16 : vector<32x128xbf16> to vector<32x128xf32>
    %18 = arith.addf %15, %17 : vector<32x128xf32>
    %19 = arith.truncf %18 : vector<32x128xf32> to vector<32x128xbf16>
    %c0_14 = arith.constant 0 : index
    %c0_15 = arith.constant 0 : index
    %20 = vector.load %arg7[%c0_14, %c0_15] : memref<32x128xbf16, #tpu.memory_space<vmem>>, vector<32x128xbf16>
    tpu.vector_store %arg7[%c0_14, %c0_15], %19 {strides = array<i32>} : memref<32x128xbf16, #tpu.memory_space<vmem>>, vector<32x128xbf16>,
    return
  }
  func.func @transform_0(%arg0: i32) -> (i32, i32) {
    %c0_i32 = arith.constant 0 : i32
    %c0_i32_0 = arith.constant 0 : i32
    return %arg0, %c0_i32 : i32, i32
  }
  func.func @transform_1(%arg0: i32) -> (i32, i32) {
    %c0_i32 = arith.constant 0 : i32
    %c0_i32_0 = arith.constant 0 : i32
    %c0_i32_1 = arith.constant 0 : i32
    return %c0_i32, %c0_i32_0 : i32, i32
  }
  func.func @transform_2(%arg0: i32) -> (i32, i32) {
    %c0_i32 = arith.constant 0 : i32
    %c0_i32_0 = arith.constant 0 : i32
    %c0_i32_1 = arith.constant 0 : i32
    return %c0_i32, %c0_i32_0 : i32, i32
  }
  func.func @transform_3(%arg0: i32) -> (i32, i32) {
    %c0_i32 = arith.constant 0 : i32
    %c0_i32_0 = arith.constant 0 : i32
    %c0_i32_1 = arith.constant 0 : i32
    return %c0_i32, %c0_i32_0 : i32, i32
  }
  func.func @transform_4(%arg0: i32) -> (i32, i32) {
    %c0_i32 = arith.constant 0 : i32
    %c0_i32_0 = arith.constant 0 : i32
    %c0_i32_1 = arith.constant 0 : i32
    return %c0_i32, %c0_i32_0 : i32, i32
  }
  func.func @transform_5(%arg0: i32) -> (i32, i32) {
    %c0_i32 = arith.constant 0 : i32
    %c0_i32_0 = arith.constant 0 : i32
    return %arg0, %c0_i32 : i32, i32
  }
  func.func @transform_6(%arg0: i32) -> (i32, i32) {
    %c0_i32 = arith.constant 0 : i32
    %c0_i32_0 = arith.constant 0 : i32
    return %arg0, %c0_i32 : i32, i32
  }
}

</mosaic_0001>

<bundles_post_ra>
// kernel: encoder_forward.5
= control target key start
LH: loop header
LB: loop body
LE: loop exit
PB: predicated region body
PF: predicated region fallthrough
CT: control target
= control target key end

     0   :  { %vm110_vm0 = vcmask 523264   ;;  %s579_s1 = inlined_call_operand.vmem [shape: bf16[64,128], index: 1, kind: input, shape index: {}]   ;;  %s580_s0 = inlined_call_operand.vmem [shape: bf16[128,64], index: 0, kind: input, shape index: {}]   ;;  %s581_s2 = inlined_call_operand.vmem [shape: f32[1,128], index: 2, kind: input, shape index: {}]   ;;  %s582_s3 = inlined_call_operand.vmem [shape: bf16[128,128], index: 3, kind: output, shape index: {}]  }
   0x1   :  { %v476_v0 = vld [vmem:[%s579_s1 + $0x18] sm:$0xff]   ;;  %v477_v1 = vld [vmem:[%s579_s1 + $0x10] sm:$0xff]   ;;  %v478_v2 = vld [vmem:[%s579_s1 + $0x8] sm:$0xff]  }
   0x2   :  { %444 = vmatprep.subr.bf16.mxu0 %v476_v0  ;;  %468 = vmatprep.subr.bf16.mxu1 %v476_v0  ;;  %v480_v3 = vld [vmem:[%s580_s0] sm:$0xff]   ;;  %v482_v6 = vld [vmem:[%s580_s0 + $0x8] sm:$0xff]   ;;  %v484_v8 = vld [vmem:[%s580_s0 + $0x10] sm:$0xff]  }
   0x3   :  { %445 = vmatpush3.bf16.msra.mxu0 %v476_v0  ;;  %472 = vmatpush3.bf16.msra.mxu1 %v476_v0  ;;  %v481_v4 = vld [vmem:[%s580_s0 + $0x20] sm:$0xff]   ;;  %v483_v7 = vld [vmem:[%s580_s0 + $0x28] sm:$0xff]   ;;  %v485_v9 = vld [vmem:[%s580_s0 + $0x30] sm:$0xff]  }
   0x4   :  { %446 = vmatprep.subr.bf16.mxu0 %v477_v1  ;;  %469 = vmatprep.subr.bf16.mxu1 %v477_v1  ;;  %v479_v5 = vld [vmem:[%s579_s1] sm:$0xff]   ;;  %v486_v10 = vld [vmem:[%s580_s0 + $0x18] sm:$0xff]  }
   0x5   :  { %452 = vmatprep.mubr.msk.bf16.mxu0 %vm110_vm0, %v480_v3  ;;  %460 = vmatprep.mubr.msk.bf16.mxu1 %vm110_vm0, %v481_v4  ;;  %v487_v11 = vld [vmem:[%s580_s0 + $0x38] sm:$0xff]   ;;  %v332_v12 = vld [vmem:[%s581_s2] ss:$0 sm:$0xff] }
   0x7   :  { %447 = vmatpush3.bf16.msra.mxu0 %v477_v1  ;;  %473 = vmatpush3.bf16.msra.mxu1 %v477_v1 }
   0x8   :  { %448 = vmatprep.subr.bf16.mxu0 %v478_v2  ;;  %470 = vmatprep.subr.bf16.mxu1 %v478_v2 }
   0xb   :  { %449 = vmatpush3.bf16.msra.mxu0 %v478_v2  ;;  %474 = vmatpush3.bf16.msra.mxu1 %v478_v2 }
   0xc   :  { %450 = vmatprep.subr.bf16.mxu0 %v479_v5  ;;  %471 = vmatprep.subr.bf16.mxu1 %v479_v5 }
   0xf   :  { %451 = vmatpush3.bf16.msra.mxu0 %v479_v5  ;;  %475 = vmatpush3.bf16.msra.mxu1 %v479_v5 }
  0x12   :  { %453 = vmatmul.mubr.msk.bf16.vlgmr.msra.gmra.mxu0 %vm110_vm0, %v482_v6  ;;  %461 = vmatmul.mubr.msk.bf16.vlgmr.msra.gmra.mxu1 %vm110_vm0, %v483_v7 }
  0x13   :  { %456 = vmatprep.mubr.msk.bf16.mxu0 %vm110_vm0, %v484_v8  ;;  %464 = vmatprep.mubr.msk.bf16.mxu1 %vm110_vm0, %v485_v9 }
  0x1a   :  { %457 = vmatmul.mubr.msk.bf16.gmra.mxu0 %vm110_vm0, %v486_v10  ;;  %465 = vmatmul.mubr.msk.bf16.gmra.mxu1 %vm110_vm0, %v487_v11 }
  0xd2   :  { %v454_v13 = vpop.f32.mrf.mxu0  ;;  %v462_v14 = vpop.f32.mrf.mxu1 }
  0xd3   :  { %v178_v15 = vadd.f32 %v454_v13, %v332_v12  ;;  %v210_v16 = vadd.f32 %v462_v14, %v332_v12 }
  0xd4   :  { %v169_v17 = vpop.f32.mrf.mxu0  ;;  %v201_v18 = vpop.f32.mrf.mxu1 }
  0xd5   :  { %v170_v19 = vadd.f32 %v332_v12, %v169_v17  ;;  %v202_v20 = vadd.f32 %v332_v12, %v201_v18  ;;  %v234_v25 = vmax.f32 %v178_v15, 0.0  ;;  %v242_v26 = vmax.f32 %v210_v16, 0.0 }
  0xd6   :  { %v455_v21 = vpop.f32.mrf.mxu0  ;;  %v463_v22 = vpop.f32.mrf.mxu1 }
  0xd7   :  { %v181_v23 = vadd.f32 %v455_v21, %v332_v12  ;;  %v213_v24 = vadd.f32 %v463_v22, %v332_v12  ;;  %v232_v33 = vmax.f32 %v170_v19, 0.0  ;;  %v240_v34 = vmax.f32 %v202_v20, 0.0 }
  0xd8   :  { %v172_v27 = vpop.f32.mrf.mxu0  ;;  %v204_v28 = vpop.f32.mrf.mxu1 }
  0xd9   :  { %v235_v29 = vmax.f32 %v181_v23, 0.0  ;;  %v243_v30 = vmax.f32 %v213_v24, 0.0  ;;  %v173_v31 = vadd.f32 %v332_v12, %v172_v27  ;;  %v205_v32 = vadd.f32 %v332_v12, %v204_v28 }
  0xda   :  { %v458_v35 = vpop.f32.mrf.mxu0  ;;  %v466_v36 = vpop.f32.mrf.mxu1 }
  0xdb   :  { %v393_v37 = vpack.c.bf16 %v235_v29, %v234_v25  ;;  %v413_v38 = vpack.c.bf16 %v243_v30, %v242_v26  ;;  %v233_v39 = vmax.f32 %v173_v31, 0.0  ;;  %v241_v40 = vmax.f32 %v205_v32, 0.0 }
  0xdc   :  { %v194_v41 = vadd.f32 %v458_v35, %v332_v12  ;;  %v226_v42 = vadd.f32 %v466_v36, %v332_v12  ;;  %v185_v43 = vpop.f32.mrf.mxu0  ;;  %v217_v44 = vpop.f32.mrf.mxu1 }
  0xdd   :  { %425 = vst [vmem:[%s582_s3 + $0x8] sm:$0xff] %v393_v37   ;;  %429 = vst [vmem:[%s582_s3 + $0x28] sm:$0xff] %v413_v38   ;;  %v388_v45 = vpack.c.bf16 %v233_v39, %v232_v33  ;;  %v408_v46 = vpack.c.bf16 %v241_v40, %v240_v34  ;;  %v186_v47 = vadd.f32 %v332_v12, %v185_v43 }
  0xde   :  { %v218_v48 = vadd.f32 %v332_v12, %v217_v44  ;;  %v459_v49 = vpop.f32.mrf.mxu0  ;;  %v467_v50 = vpop.f32.mrf.mxu1  ;;  %v238_v53 = vmax.f32 %v194_v41, 0.0  ;;  %v246_v54 = vmax.f32 %v226_v42, 0.0 }
  0xdf   :  { %389 = vst [vmem:[%s582_s3] sm:$0xff] %v388_v45   ;;  %428 = vst [vmem:[%s582_s3 + $0x20] sm:$0xff] %v408_v46   ;;  %v197_v51 = vadd.f32 %v459_v49, %v332_v12  ;;  %v229_v52 = vadd.f32 %v467_v50, %v332_v12  ;;  %v236_v61 = vmax.f32 %v186_v47, 0.0 }
  0xe0   :  { %v188_v55 = vpop.f32.mrf.mxu0  ;;  %v220_v56 = vpop.f32.mrf.mxu1  ;;  %v244_v62 = vmax.f32 %v218_v48, 0.0 }
  0xe1   :  { %v239_v57 = vmax.f32 %v197_v51, 0.0  ;;  %v247_v58 = vmax.f32 %v229_v52, 0.0  ;;  %v189_v59 = vadd.f32 %v332_v12, %v188_v55  ;;  %v221_v60 = vadd.f32 %v332_v12, %v220_v56 }
  0xe3   :  { %v403_v63 = vpack.c.bf16 %v239_v57, %v238_v53  ;;  %v423_v0 = vpack.c.bf16 %v247_v58, %v246_v54  ;;  %v237_v1 = vmax.f32 %v189_v59, 0.0  ;;  %v245_v2 = vmax.f32 %v221_v60, 0.0 }
  0xe5   :  { %427 = vst [vmem:[%s582_s3 + $0x18] sm:$0xff] %v403_v63   ;;  %431 = vst [vmem:[%s582_s3 + $0x38] sm:$0xff] %v423_v0   ;;  %v398_v3 = vpack.c.bf16 %v237_v1, %v236_v61  ;;  %v418_v4 = vpack.c.bf16 %v245_v2, %v244_v62 }
  0xe7   :  { %426 = vst [vmem:[%s582_s3 + $0x10] sm:$0xff] %v398_v3   ;;  %430 = vst [vmem:[%s582_s3 + $0x30] sm:$0xff] %v418_v4  }

// kernel: encoder_forward.6
= control target key start
LH: loop header
LB: loop body
LE: loop exit
PB: predicated region body
PF: predicated region fallthrough
CT: control target
= control target key end

     0   :  { %s446_s1 = inlined_call_operand.vmem [shape: bf16[256,128], index: 1, kind: input, shape index: {}]   ;;  %s447_s0 = inlined_call_operand.vmem [shape: bf16[32,256], index: 0, kind: input, shape index: {}]   ;;  %s448_s2 = inlined_call_operand.vmem [shape: f32[1,128], index: 2, kind: input, shape index: {}]   ;;  %s449_s3 = inlined_call_operand.vmem [shape: bf16[32,128], index: 3, kind: output, shape index: {}]  }
   0x1   :  { %v335_v0 = vld [vmem:[%s446_s1 + $0x78] sm:$0xff]   ;;  %v337_v2 = vld [vmem:[%s446_s1 + $0x70] sm:$0xff]   ;;  %v339_v4 = vld [vmem:[%s446_s1 + $0x68] sm:$0xff]  }
   0x2   :  { %v336_v1 = vld [vmem:[%s446_s1 + $0x38] sm:$0xff]   ;;  %291 = vmatprep.subr.bf16.mxu0 %v335_v0  ;;  %319 = vmatprep.subr.bf16.mxu1 %v335_v0  ;;  %v338_v3 = vld [vmem:[%s446_s1 + $0x30] sm:$0xff]   ;;  %v340_v5 = vld [vmem:[%s446_s1 + $0x28] sm:$0xff]  }
   0x3   :  { %292 = vmatpush3.bf16.msra.mxu0 %v336_v1  ;;  %327 = vmatpush3.bf16.msra.mxu1 %v336_v1  ;;  %v341_v6 = vld [vmem:[%s446_s1 + $0x60] sm:$0xff]   ;;  %v343_v8 = vld [vmem:[%s446_s1 + $0x58] sm:$0xff]   ;;  %v345_v10 = vld [vmem:[%s446_s1 + $0x50] sm:$0xff]  }
   0x4   :  { %293 = vmatprep.subr.bf16.mxu0 %v337_v2  ;;  %320 = vmatprep.subr.bf16.mxu1 %v337_v2  ;;  %v342_v7 = vld [vmem:[%s446_s1 + $0x20] sm:$0xff]   ;;  %v344_v9 = vld [vmem:[%s446_s1 + $0x18] sm:$0xff]   ;;  %v346_v13 = vld [vmem:[%s446_s1 + $0x10] sm:$0xff]  }
   0x5   :  { %v353_v11 = vld [vmem:[%s447_s0 + $0x4] ss:$8 sps:$4 sm:$0xff]   ;;  %v356_v12 = vld [vmem:[%s447_s0 + $0x14] ss:$8 sps:$4 sm:$0xff]   ;;  %v351_v18 = vld [vmem:[%s447_s0] ss:$8 sps:$4 sm:$0xff]  }
   0x6   :  { %v347_v14 = vld [vmem:[%s446_s1 + $0x48] sm:$0xff]   ;;  %206 = vmatprep.mubr.bf16.mxu0 %v353_v11  ;;  %214 = vmatprep.mubr.bf16.mxu1 %v356_v12  ;;  %v349_v16 = vld [vmem:[%s446_s1 + $0x40] sm:$0xff]   ;;  %v354_v19 = vld [vmem:[%s447_s0 + $0x10] ss:$8 sps:$4 sm:$0xff]  }
   0x7   :  { %294 = vmatpush3.bf16.msra.mxu0 %v338_v3  ;;  %328 = vmatpush3.bf16.msra.mxu1 %v338_v3  ;;  %v348_v15 = vld [vmem:[%s446_s1 + $0x8] sm:$0xff]   ;;  %v350_v17 = vld [vmem:[%s446_s1] sm:$0xff]  }
   0x8   :  { %295 = vmatprep.subr.bf16.mxu0 %v339_v4  ;;  %321 = vmatprep.subr.bf16.mxu1 %v339_v4  ;;  %v251_v26 = vld [vmem:[%s448_s2] ss:$0 sm:$0xff] }
   0xb   :  { %296 = vmatpush3.bf16.msra.mxu0 %v340_v5  ;;  %329 = vmatpush3.bf16.msra.mxu1 %v340_v5 }
   0xc   :  { %297 = vmatprep.subr.bf16.mxu0 %v341_v6  ;;  %322 = vmatprep.subr.bf16.mxu1 %v341_v6 }
   0xf   :  { %298 = vmatpush3.bf16.msra.mxu0 %v342_v7  ;;  %330 = vmatpush3.bf16.msra.mxu1 %v342_v7 }
  0x10   :  { %299 = vmatprep.subr.bf16.mxu0 %v343_v8  ;;  %323 = vmatprep.subr.bf16.mxu1 %v343_v8 }
  0x13   :  { %300 = vmatpush3.bf16.msra.mxu0 %v344_v9  ;;  %331 = vmatpush3.bf16.msra.mxu1 %v344_v9 }
  0x14   :  { %301 = vmatprep.subr.bf16.mxu0 %v345_v10  ;;  %324 = vmatprep.subr.bf16.mxu1 %v345_v10 }
  0x17   :  { %302 = vmatpush3.bf16.msra.mxu0 %v346_v13  ;;  %332 = vmatpush3.bf16.msra.mxu1 %v346_v13 }
  0x18   :  { %303 = vmatprep.subr.bf16.mxu0 %v347_v14  ;;  %325 = vmatprep.subr.bf16.mxu1 %v347_v14 }
  0x1b   :  { %304 = vmatpush3.bf16.msra.mxu0 %v348_v15  ;;  %333 = vmatpush3.bf16.msra.mxu1 %v348_v15 }
  0x1c   :  { %305 = vmatprep.subr.bf16.mxu0 %v349_v16  ;;  %326 = vmatprep.subr.bf16.mxu1 %v349_v16 }
  0x1f   :  { %306 = vmatpush3.bf16.msra.mxu0 %v350_v17  ;;  %334 = vmatpush3.bf16.msra.mxu1 %v350_v17 }
  0x22   :  { %207 = vmatmul.mubr.bf16.vlgmr.msra.gmra.mxu0 %v351_v18  ;;  %215 = vmatmul.mubr.bf16.vlgmr.msra.gmra.mxu1 %v354_v19 }
  0xe2   :  { %v307_v20 = vpop.f32.mrf.mxu0  ;;  %v313_v21 = vpop.f32.mrf.mxu1 }
  0xe4   :  { %v308_v22 = vpop.f32.mrf.mxu0  ;;  %v314_v23 = vpop.f32.mrf.mxu1 }
  0xe5   :  { %v309_v24 = vadd.f32 %v308_v22, %v307_v20  ;;  %v315_v25 = vadd.f32 %v314_v23, %v313_v21 }
  0xe6   :  { %v310_v27 = vpop.f32.mrf.mxu0  ;;  %v316_v28 = vpop.f32.mrf.mxu1 }
  0xe7   :  { %v209_v31 = vadd.f32 %v309_v24, %v251_v26  ;;  %v217_v32 = vadd.f32 %v315_v25, %v251_v26 }
  0xe8   :  { %v311_v29 = vpop.f32.mrf.mxu0  ;;  %v317_v30 = vpop.f32.mrf.mxu1 }
  0xe9   :  { %v312_v33 = vadd.f32 %v311_v29, %v310_v27  ;;  %v318_v34 = vadd.f32 %v317_v30, %v316_v28  ;;  %v223_v37 = vmax.f32 %v209_v31, 0.0  ;;  %v225_v38 = vmax.f32 %v217_v32, 0.0 }
  0xeb   :  { %v212_v35 = vadd.f32 %v312_v33, %v251_v26  ;;  %v220_v36 = vadd.f32 %v318_v34, %v251_v26 }
  0xed   :  { %v224_v39 = vmax.f32 %v212_v35, 0.0  ;;  %v226_v40 = vmax.f32 %v220_v36, 0.0 }
  0xef   :  { %v283_v41 = vpack.c.bf16 %v224_v39, %v223_v37  ;;  %v288_v42 = vpack.c.bf16 %v226_v40, %v225_v38 }
  0xf1   :  { %284 = vst [vmem:[%s449_s3] sm:$0xff] %v283_v41   ;;  %290 = vst [vmem:[%s449_s3 + $0x8] sm:$0xff] %v288_v42  }

// kernel: encoder_forward.7
= control target key start
LH: loop header
LB: loop body
LE: loop exit
PB: predicated region body
PF: predicated region fallthrough
CT: control target
= control target key end

     0   :  { %vm204_vm0 = vcmask 261120   ;;  %s546_s1 = inlined_call_operand.vmem [shape: bf16[288,128], index: 1, kind: input, shape index: {}]   ;;  %s547_s0 = inlined_call_operand.vmem [shape: bf16[32,288], index: 0, kind: input, shape index: {}]   ;;  %s548_s2 = inlined_call_operand.vmem [shape: f32[1,128], index: 2, kind: input, shape index: {}]   ;;  %s549_s3 = inlined_call_operand.vmem [shape: bf16[32,128], index: 3, kind: output, shape index: {}]  }
   0x1   :  { %v419_v0 = vld [vmem:[%s546_s1 + $0x78] sm:$0xff]   ;;  %v421_v2 = vld [vmem:[%s546_s1 + $0x70] sm:$0xff]   ;;  %v423_v4 = vld [vmem:[%s546_s1 + $0x68] sm:$0xff]  }
   0x2   :  { %v420_v1 = vld [vmem:[%s546_s1 + $0x38] sm:$0xff]   ;;  %379 = vmatprep.subr.bf16.mxu0 %v419_v0  ;;  %v422_v3 = vld [vmem:[%s546_s1 + $0x30] sm:$0xff]   ;;  %v424_v5 = vld [vmem:[%s546_s1 + $0x28] sm:$0xff]  }
   0x3   :  { %380 = vmatpush3.bf16.msra.mxu0 %v420_v1  ;;  %v425_v6 = vld [vmem:[%s546_s1 + $0x60] sm:$0xff]   ;;  %v427_v8 = vld [vmem:[%s546_s1 + $0x58] sm:$0xff]   ;;  %v434_v10 = vld [vmem:[%s546_s1 + $0x88] sm:$0xff]  }
   0x4   :  { %381 = vmatprep.subr.bf16.mxu0 %v421_v2  ;;  %v426_v7 = vld [vmem:[%s546_s1 + $0x20] sm:$0xff]   ;;  %v428_v9 = vld [vmem:[%s546_s1 + $0x18] sm:$0xff]   ;;  %v429_v11 = vld [vmem:[%s546_s1 + $0x50] sm:$0xff]   ;;  %411 = vmatprep.subr.bf16.mxu1 %v434_v10 }
   0x5   :  { %v430_v12 = vld [vmem:[%s546_s1 + $0x10] sm:$0xff]   ;;  %v431_v13 = vld [vmem:[%s546_s1 + $0x48] sm:$0xff]   ;;  %412 = vmatpush3.bf16.msra.mxu1 %v434_v10  ;;  %v439_v15 = vld [vmem:[%s546_s1 + $0x80] sm:$0xff]  }
   0x6   :  { %v438_v14 = vld [vmem:[%s547_s0 + $0x4] ss:$12 sps:$4 sm:$0xff]   ;;  %v440_v16 = vld [vmem:[%s547_s0 + $0x8] ss:$12 sps:$4 sm:$0xff]   ;;  %413 = vmatprep.subr.bf16.mxu1 %v439_v15  ;;  %v441_v17 = vld [vmem:[%s547_s0 + $0x20] ss:$12 sps:$4 sm:$0xff]  }
   0x7   :  { %382 = vmatpush3.bf16.msra.mxu0 %v422_v3  ;;  %243 = vmatprep.mubr.bf16.mxu0 %v438_v14  ;;  %v432_v18 = vld [vmem:[%s546_s1 + $0x8] sm:$0xff]   ;;  %v433_v19 = vld [vmem:[%s546_s1 + $0x40] sm:$0xff]  }
   0x8   :  { %383 = vmatprep.subr.bf16.mxu0 %v423_v4  ;;  %415 = vmatprep.mubr.msk.bf16.mxu1 %vm204_vm0, %v440_v16  ;;  %v435_v20 = vld [vmem:[%s546_s1] sm:$0xff]   ;;  %v442_v22 = vld [vmem:[%s547_s0 + $0x1c] ss:$12 sps:$4 sm:$0xff]  }
   0x9   :  { %414 = vmatpush3.bf16.msra.mxu1 %v439_v15  ;;  %v436_v21 = vld [vmem:[%s547_s0] ss:$12 sps:$4 sm:$0xff]   ;;  %v444_v23 = vld [vmem:[%s547_s0 + $0x18] ss:$12 sps:$4 sm:$0xff]  }
   0xa   :  { %v333_v30 = vld [vmem:[%s548_s2] ss:$0 sm:$0xff] }
   0xb   :  { %384 = vmatpush3.bf16.msra.mxu0 %v424_v5 }
   0xc   :  { %385 = vmatprep.subr.bf16.mxu0 %v425_v6  ;;  %416 = vmatmul.mubr.msk.bf16.vlgmr.msra.gmra.mxu1 %vm204_vm0, %v441_v17 }
   0xf   :  { %386 = vmatpush3.bf16.msra.mxu0 %v426_v7 }
  0x10   :  { %387 = vmatprep.subr.bf16.mxu0 %v427_v8 }
  0x13   :  { %388 = vmatpush3.bf16.msra.mxu0 %v428_v9 }
  0x14   :  { %389 = vmatprep.subr.bf16.mxu0 %v429_v11 }
  0x17   :  { %390 = vmatpush3.bf16.msra.mxu0 %v430_v12 }
  0x18   :  { %391 = vmatprep.subr.bf16.mxu0 %v431_v13 }
  0x1b   :  { %392 = vmatpush3.bf16.msra.mxu0 %v432_v18 }
  0x1c   :  { %393 = vmatprep.subr.bf16.mxu0 %v433_v19 }
  0x1f   :  { %394 = vmatpush3.bf16.msra.mxu0 %v435_v20 }
  0x22   :  { %244 = vmatmul.mubr.bf16.vlgmr.msra.gmra.mxu0 %v436_v21 }
  0x23   :  { %251 = vmatprep.mubr.bf16.mxu0 %v442_v22 }
  0x2a   :  { %252 = vmatmul.mubr.bf16.gmra.mxu0 %v444_v23 }
  0xcc   :  { %v417_v24 = vpop.f32.mrf.mxu1 }
  0xce   :  { %v294_v26 = vpop.f32.mrf.mxu1 }
  0xd0   :  { %v418_v31 = vpop.f32.mrf.mxu1 }
  0xd2   :  { %v297_v36 = vpop.f32.mrf.mxu1 }
  0xe2   :  { %v395_v25 = vpop.f32.mrf.mxu0 }
  0xe4   :  { %v396_v27 = vpop.f32.mrf.mxu0 }
  0xe5   :  { %v397_v28 = vadd.f32 %v396_v27, %v395_v25 }
  0xe6   :  { %v398_v29 = vpop.f32.mrf.mxu0 }
  0xe7   :  { %v246_v34 = vadd.f32 %v397_v28, %v333_v30 }
  0xe8   :  { %v399_v32 = vpop.f32.mrf.mxu0 }
  0xe9   :  { %v400_v33 = vadd.f32 %v399_v32, %v398_v29  ;;  %v295_v39 = vadd.f32 %v294_v26, %v246_v34 }
  0xea   :  { %v401_v35 = vpop.f32.mrf.mxu0 }
  0xeb   :  { %v249_v37 = vadd.f32 %v400_v33, %v333_v30 }
  0xec   :  { %v402_v38 = vpop.f32.mrf.mxu0 }
  0xed   :  { %v403_v40 = vadd.f32 %v402_v38, %v401_v35  ;;  %v298_v41 = vadd.f32 %v297_v36, %v249_v37 }
  0xee   :  { %v404_v42 = vpop.f32.mrf.mxu0 }
  0xef   :  { %v371_v43 = vpack.c.bf16 %v298_v41, %v295_v39  ;;  %v254_v45 = vadd.f32 %v403_v40, %v333_v30 }
  0xf0   :  { %v405_v44 = vpop.f32.mrf.mxu0 }
  0xf1   :  { %372 = vst [vmem:[%s549_s3] sm:$0xff] %v371_v43   ;;  %v406_v46 = vadd.f32 %v405_v44, %v404_v42  ;;  %v303_v48 = vadd.f32 %v417_v24, %v254_v45 }
  0xf3   :  { %v257_v47 = vadd.f32 %v406_v46, %v333_v30 }
  0xf5   :  { %v306_v49 = vadd.f32 %v418_v31, %v257_v47 }
  0xf7   :  { %v376_v50 = vpack.c.bf16 %v306_v49, %v303_v48 }
  0xf9   :  { %378 = vst [vmem:[%s549_s3 + $0x8] sm:$0xff] %v376_v50  }

// kernel: encoder_forward.9
= control target key start
LH: loop header
LB: loop body
LE: loop exit
PB: predicated region body
PF: predicated region fallthrough
CT: control target
= control target key end

     0   :  { %v653_v15 = vmov 0   ;;  %vm221_vm0 = vcmask 261120   ;;  %s811_s1 = inlined_call_operand.vmem [shape: bf16[288,128], index: 1, kind: input, shape index: {}]   ;;  %s812_s0 = inlined_call_operand.vmem [shape: bf16[32,288], index: 0, kind: input, shape index: {}]   ;;  %s813_s3 = inlined_call_operand.vmem [shape: bf16[128,128], index: 3, kind: input, shape index: {}]   ;;  %s814_s2 = inlined_call_operand.vmem [shape: f32[1,128], index: 2, kind: input, shape index: {}]   ;;  %s815_s4 = inlined_call_operand.vmem [shape: f32[1,128], index: 4, kind: input, shape index: {}]   ;;  %s816_s5 = inlined_call_operand.vmem [shape: bf16[32,128], index: 5, kind: input, shape index: {}]   ;;  %s817_s6 = inlined_call_operand.vmem [shape: bf16[32,128], index: 6, kind: output, shape index: {}]  }
   0x1   :  { %v627_v0 = vld [vmem:[%s811_s1 + $0x78] sm:$0xff]   ;;  %v629_v2 = vld [vmem:[%s811_s1 + $0x70] sm:$0xff]   ;;  %v631_v4 = vld [vmem:[%s811_s1 + $0x68] sm:$0xff]  }
   0x2   :  { %v628_v1 = vld [vmem:[%s811_s1 + $0x38] sm:$0xff]   ;;  %556 = vmatprep.subr.bf16.mxu0 %v627_v0  ;;  %v630_v3 = vld [vmem:[%s811_s1 + $0x30] sm:$0xff]   ;;  %v632_v5 = vld [vmem:[%s811_s1 + $0x28] sm:$0xff]  }
   0x3   :  { %557 = vmatpush3.bf16.msra.mxu0 %v628_v1  ;;  %v633_v6 = vld [vmem:[%s811_s1 + $0x60] sm:$0xff]   ;;  %v635_v8 = vld [vmem:[%s811_s1 + $0x58] sm:$0xff]   ;;  %v642_v10 = vld [vmem:[%s811_s1 + $0x88] sm:$0xff]  }
   0x4   :  { %558 = vmatprep.subr.bf16.mxu0 %v629_v2  ;;  %v634_v7 = vld [vmem:[%s811_s1 + $0x20] sm:$0xff]   ;;  %v636_v9 = vld [vmem:[%s811_s1 + $0x18] sm:$0xff]   ;;  %v637_v11 = vld [vmem:[%s811_s1 + $0x50] sm:$0xff]   ;;  %598 = vmatprep.subr.bf16.mxu1 %v642_v10 }
   0x5   :  { %v638_v12 = vld [vmem:[%s811_s1 + $0x10] sm:$0xff]   ;;  %v24_v13 = vld [vmem:[%s812_s0] sm:$0xff]  ;;  %599 = vmatpush3.bf16.msra.mxu1 %v642_v10  ;;  %v25_v19 = vld [vmem:[%s812_s0 + $0x8] sm:$0xf] }
   0x6   :  { %v26_v14 = vld [vmem:[%s812_s0 + $0xc] sm:$0xff]  ;;  %v32_v16 = vmax.bf16 %v653_v15, %v24_v13  ;;  %v644_v18 = vld [vmem:[%s811_s1 + $0x80] sm:$0xff]   ;;  %v27_v20 = vld [vmem:[%s812_s0 + $0x14] sm:$0xf]  ;;  %v33_v21 = vmax.bf16 %v653_v15, %v25_v19 }
   0x7   :  { %559 = vmatpush3.bf16.msra.mxu0 %v630_v3  ;;  %v34_v17 = vmax.bf16 %v653_v15, %v26_v14  ;;  %v29_v22 = vld [vmem:[%s812_s0 + $0x20] sm:$0xf]  ;;  %v31_v23 = vld [vmem:[%s812_s0 + $0x2c] sm:$0xf]  ;;  %600 = vmatprep.subr.bf16.mxu1 %v644_v18  ;;  %v35_v26 = vmax.bf16 %v653_v15, %v27_v20  ;;  %v645_v30 = vld [vmem:[%s813_s3 + $0x38] sm:$0xff]  }
   0x8   :  { %560 = vmatprep.subr.bf16.mxu0 %v631_v4  ;;  %v639_v24 = vld [vmem:[%s811_s1 + $0x48] sm:$0xff]   ;;  %v37_v28 = vmax.bf16 %v653_v15, %v29_v22  ;;  %v39_v29 = vmax.bf16 %v653_v15, %v31_v23  ;;  %v641_v31 = vld [vmem:[%s811_s1 + $0x40] sm:$0xff]   ;;  %v28_v33 = vld [vmem:[%s812_s0 + $0x18] sm:$0xff] }
   0x9   :  { %v494_v25 = vcombine.high %v32_v16, %v34_v17  ;;  %v640_v27 = vld [vmem:[%s811_s1 + $0x8] sm:$0xff]   ;;  %601 = vmatpush3.bf16.msra.mxu1 %v644_v18  ;;  %v495_v32 = vcombine.low %v33_v21, %v35_v26  ;;  %v646_v35 = vld [vmem:[%s813_s3 + $0x30] sm:$0xff]   ;;  %v643_v37 = vld [vmem:[%s811_s1] sm:$0xff]   ;;  %v36_v38 = vmax.bf16 %v653_v15, %v28_v33  ;;  %v493_v40 = vcombine.low %v32_v16, %v34_v17 }
   0xa   :  { %v30_v34 = vld [vmem:[%s812_s0 + $0x24] sm:$0xff]  ;;  %v498_v36 = vcombine.low %v37_v28, %v39_v29  ;;  %606 = vmatprep.subr.bf16.mxu1 %v645_v30  ;;  %v649_v45 = vld [vmem:[%s813_s3 + $0x18] sm:$0xff]   ;;  %v650_v46 = vld [vmem:[%s813_s3 + $0x10] sm:$0xff]  }
   0xb   :  { %561 = vmatpush3.bf16.msra.mxu0 %v632_v5  ;;  %260 = vmatprep.mubr.bf16.mxu0 %v494_v25  ;;  %v38_v39 = vmax.bf16 %v653_v15, %v30_v34  ;;  %v647_v43 = vld [vmem:[%s813_s3 + $0x28] sm:$0xff]   ;;  %v648_v44 = vld [vmem:[%s813_s3 + $0x20] sm:$0xff]  }
   0xc   :  { %562 = vmatprep.subr.bf16.mxu0 %v633_v6  ;;  %602 = vmatprep.mubr.msk.bf16.mxu1 %vm221_vm0, %v495_v32  ;;  %v651_v47 = vld [vmem:[%s813_s3 + $0x8] sm:$0xff]   ;;  %v652_v48 = vld [vmem:[%s813_s3] sm:$0xff]  }
   0xd   :  { %603 = vmatmul.mubr.msk.bf16.vlgmr.msra.gmra.mxu1 %vm221_vm0, %v498_v36  ;;  %v497_v41 = vcombine.high %v36_v38, %v38_v39  ;;  %v496_v42 = vcombine.low %v36_v38, %v38_v39  ;;  %v492_v53 = vld [vmem:[%s814_s2] ss:$0 sm:$0xff]  ;;  %v554_v17 = vld [vmem:[%s816_s5 + $0x8] sm:$0xff]  }
   0xe   :  { %607 = vmatpush3.bf16.msra.mxu1 %v645_v30  ;;  %v519_v16 = vld [vmem:[%s815_s4] ss:$0 sm:$0xff]  ;;  %v542_v21 = vunpack.c.l.bf16 %v554_v17  ;;  %v543_v25 = vunpack.c.h.bf16 %v554_v17 }
   0xf   :  { %563 = vmatpush3.bf16.msra.mxu0 %v634_v7  ;;  %608 = vmatprep.subr.bf16.mxu1 %v646_v35  ;;  %v537_v19 = vld [vmem:[%s816_s5] sm:$0xff]  }
  0x10   :  { %564 = vmatprep.subr.bf16.mxu0 %v635_v8  ;;  %v539_v29 = vunpack.c.h.bf16 %v537_v19 }
  0x12   :  { %609 = vmatpush3.bf16.msra.mxu1 %v646_v35 }
  0x13   :  { %565 = vmatpush3.bf16.msra.mxu0 %v636_v9  ;;  %610 = vmatprep.subr.bf16.mxu1 %v647_v43 }
  0x14   :  { %566 = vmatprep.subr.bf16.mxu0 %v637_v11 }
  0x16   :  { %611 = vmatpush3.bf16.msra.mxu1 %v647_v43 }
  0x17   :  { %567 = vmatpush3.bf16.msra.mxu0 %v638_v12  ;;  %612 = vmatprep.subr.bf16.mxu1 %v648_v44 }
  0x18   :  { %568 = vmatprep.subr.bf16.mxu0 %v639_v24  ;;  %v538_v24 = vunpack.c.l.bf16 %v537_v19 }
  0x1a   :  { %613 = vmatpush3.bf16.msra.mxu1 %v648_v44 }
  0x1b   :  { %569 = vmatpush3.bf16.msra.mxu0 %v640_v27  ;;  %614 = vmatprep.subr.bf16.mxu1 %v649_v45 }
  0x1c   :  { %570 = vmatprep.subr.bf16.mxu0 %v641_v31 }
  0x1e   :  { %615 = vmatpush3.bf16.msra.mxu1 %v649_v45 }
  0x1f   :  { %571 = vmatpush3.bf16.msra.mxu0 %v643_v37  ;;  %616 = vmatprep.subr.bf16.mxu1 %v650_v46 }
  0x22   :  { %261 = vmatmul.mubr.bf16.vlgmr.msra.gmra.mxu0 %v493_v40  ;;  %617 = vmatpush3.bf16.msra.mxu1 %v650_v46 }
  0x23   :  { %268 = vmatprep.mubr.bf16.mxu0 %v497_v41  ;;  %618 = vmatprep.subr.bf16.mxu1 %v651_v47 }
  0x26   :  { %619 = vmatpush3.bf16.msra.mxu1 %v651_v47 }
  0x27   :  { %620 = vmatprep.subr.bf16.mxu1 %v652_v48 }
  0x2a   :  { %269 = vmatmul.mubr.bf16.gmra.mxu0 %v496_v42  ;;  %621 = vmatpush3.bf16.msra.mxu1 %v652_v48 }
  0xcd   :  { %v604_v49 = vpop.f32.mrf.mxu1 }
  0xcf   :  { %v311_v51 = vpop.f32.mrf.mxu1 }
  0xd1   :  { %v605_v56 = vpop.f32.mrf.mxu1 }
  0xd3   :  { %v314_v61 = vpop.f32.mrf.mxu1 }
  0xe2   :  { %v572_v50 = vpop.f32.mrf.mxu0 }
  0xe4   :  { %v573_v52 = vpop.f32.mrf.mxu0 }
  0xe5   :  { %v574_v54 = vadd.f32 %v573_v52, %v572_v50 }
  0xe6   :  { %v575_v55 = vpop.f32.mrf.mxu0 }
  0xe7   :  { %v263_v57 = vadd.f32 %v574_v54, %v492_v53 }
  0xe8   :  { %v576_v58 = vpop.f32.mrf.mxu0 }
  0xe9   :  { %v577_v59 = vadd.f32 %v576_v58, %v575_v55  ;;  %v312_v62 = vadd.f32 %v311_v51, %v263_v57 }
  0xea   :  { %v578_v60 = vpop.f32.mrf.mxu0 }
  0xeb   :  { %v266_v63 = vadd.f32 %v577_v59, %v492_v53  ;;  %v326_v4 = vmax.f32 %v312_v62, 0.0 }
  0xec   :  { %v579_v0 = vpop.f32.mrf.mxu0 }
  0xed   :  { %v580_v1 = vadd.f32 %v579_v0, %v578_v60  ;;  %v315_v2 = vadd.f32 %v314_v61, %v266_v63 }
  0xee   :  { %v581_v3 = vpop.f32.mrf.mxu0 }
  0xef   :  { %v271_v5 = vadd.f32 %v580_v1, %v492_v53  ;;  %v327_v6 = vmax.f32 %v315_v2, 0.0 }
  0xf0   :  { %v582_v7 = vpop.f32.mrf.mxu0 }
  0xf1   :  { %v330_v8 = vpack.c.bf16 %v327_v6, %v326_v4  ;;  %v583_v9 = vadd.f32 %v582_v7, %v581_v3  ;;  %v320_v10 = vadd.f32 %v604_v49, %v271_v5 }
  0xf3   :  { %v274_v11 = vadd.f32 %v583_v9, %v492_v53  ;;  %622 = vmatprep.mubr.bf16.mxu1 %v330_v8  ;;  %v328_v13 = vmax.f32 %v320_v10, 0.0 }
  0xf5   :  { %v323_v12 = vadd.f32 %v605_v56, %v274_v11 }
  0xf7   :  { %v329_v14 = vmax.f32 %v323_v12, 0.0 }
  0xf9   :  { %v331_v15 = vpack.c.bf16 %v329_v14, %v328_v13 }
  0xfb   :  { %623 = vmatmul.mubr.bf16.vlgmr.msra.gmra.mxu1 %v331_v15 }
 0x1bb   :  { %v624_v18 = vpop.f32.mrf.mxu1 }
 0x1bc   :  { %v446_v20 = vadd.f32 %v624_v18, %v519_v16 }
 0x1bd   :  { %v437_v22 = vpop.f32.mrf.mxu1 }
 0x1be   :  { %v438_v23 = vadd.f32 %v519_v16, %v437_v22  ;;  %v462_v27 = vadd.f32 %v542_v21, %v446_v20 }
 0x1bf   :  { %v625_v26 = vpop.f32.mrf.mxu1 }
 0x1c0   :  { %v449_v28 = vadd.f32 %v625_v26, %v519_v16  ;;  %v460_v31 = vadd.f32 %v538_v24, %v438_v23  ;;  %v466_v34 = vmax.f32 %v462_v27, 0.0 }
 0x1c1   :  { %v440_v30 = vpop.f32.mrf.mxu1 }
 0x1c2   :  { %v463_v32 = vadd.f32 %v543_v25, %v449_v28  ;;  %v441_v33 = vadd.f32 %v519_v16, %v440_v30  ;;  %v464_v37 = vmax.f32 %v460_v31, 0.0 }
 0x1c4   :  { %v467_v35 = vmax.f32 %v463_v32, 0.0  ;;  %v461_v36 = vadd.f32 %v539_v29, %v441_v33 }
 0x1c6   :  { %v552_v38 = vpack.c.bf16 %v467_v35, %v466_v34  ;;  %v465_v39 = vmax.f32 %v461_v36, 0.0 }
 0x1c8   :  { %555 = vst [vmem:[%s817_s6 + $0x8] sm:$0xff] %v552_v38   ;;  %v547_v40 = vpack.c.bf16 %v465_v39, %v464_v37 }
 0x1ca   :  { %548 = vst [vmem:[%s817_s6] sm:$0xff] %v547_v40  }

// kernel: encoder_forward.8
= control target key start
LH: loop header
LB: loop body
LE: loop exit
PB: predicated region body
PF: predicated region fallthrough
CT: control target
= control target key end

     0   :  { %v649_v15 = vmov 0   ;;  %vm221_vm0 = vcmask 261120   ;;  %s807_s1 = inlined_call_operand.vmem [shape: bf16[288,128], index: 1, kind: input, shape index: {}]   ;;  %s808_s0 = inlined_call_operand.vmem [shape: bf16[32,288], index: 0, kind: input, shape index: {}]   ;;  %s809_s3 = inlined_call_operand.vmem [shape: bf16[128,128], index: 3, kind: input, shape index: {}]   ;;  %s810_s2 = inlined_call_operand.vmem [shape: f32[1,128], index: 2, kind: input, shape index: {}]   ;;  %s811_s4 = inlined_call_operand.vmem [shape: f32[1,128], index: 4, kind: input, shape index: {}]   ;;  %s812_s5 = inlined_call_operand.vmem [shape: bf16[32,128], index: 5, kind: input, shape index: {}]   ;;  %s813_s6 = inlined_call_operand.vmem [shape: bf16[32,128], index: 6, kind: output, shape index: {}]  }
   0x1   :  { %v623_v0 = vld [vmem:[%s807_s1 + $0x78] sm:$0xff]   ;;  %v625_v2 = vld [vmem:[%s807_s1 + $0x70] sm:$0xff]   ;;  %v627_v4 = vld [vmem:[%s807_s1 + $0x68] sm:$0xff]  }
   0x2   :  { %v624_v1 = vld [vmem:[%s807_s1 + $0x38] sm:$0xff]   ;;  %552 = vmatprep.subr.bf16.mxu0 %v623_v0  ;;  %v626_v3 = vld [vmem:[%s807_s1 + $0x30] sm:$0xff]   ;;  %v628_v5 = vld [vmem:[%s807_s1 + $0x28] sm:$0xff]  }
   0x3   :  { %553 = vmatpush3.bf16.msra.mxu0 %v624_v1  ;;  %v629_v6 = vld [vmem:[%s807_s1 + $0x60] sm:$0xff]   ;;  %v631_v8 = vld [vmem:[%s807_s1 + $0x58] sm:$0xff]   ;;  %v638_v10 = vld [vmem:[%s807_s1 + $0x88] sm:$0xff]  }
   0x4   :  { %554 = vmatprep.subr.bf16.mxu0 %v625_v2  ;;  %v630_v7 = vld [vmem:[%s807_s1 + $0x20] sm:$0xff]   ;;  %v632_v9 = vld [vmem:[%s807_s1 + $0x18] sm:$0xff]   ;;  %v633_v11 = vld [vmem:[%s807_s1 + $0x50] sm:$0xff]   ;;  %594 = vmatprep.subr.bf16.mxu1 %v638_v10 }
   0x5   :  { %v634_v12 = vld [vmem:[%s807_s1 + $0x10] sm:$0xff]   ;;  %v24_v13 = vld [vmem:[%s808_s0] sm:$0xff]  ;;  %595 = vmatpush3.bf16.msra.mxu1 %v638_v10  ;;  %v25_v19 = vld [vmem:[%s808_s0 + $0x8] sm:$0xf] }
   0x6   :  { %v26_v14 = vld [vmem:[%s808_s0 + $0xc] sm:$0xff]  ;;  %v32_v16 = vmax.bf16 %v649_v15, %v24_v13  ;;  %v640_v18 = vld [vmem:[%s807_s1 + $0x80] sm:$0xff]   ;;  %v27_v20 = vld [vmem:[%s808_s0 + $0x14] sm:$0xf]  ;;  %v33_v21 = vmax.bf16 %v649_v15, %v25_v19 }
   0x7   :  { %555 = vmatpush3.bf16.msra.mxu0 %v626_v3  ;;  %v34_v17 = vmax.bf16 %v649_v15, %v26_v14  ;;  %v29_v22 = vld [vmem:[%s808_s0 + $0x20] sm:$0xf]  ;;  %v31_v23 = vld [vmem:[%s808_s0 + $0x2c] sm:$0xf]  ;;  %596 = vmatprep.subr.bf16.mxu1 %v640_v18  ;;  %v35_v26 = vmax.bf16 %v649_v15, %v27_v20  ;;  %v641_v30 = vld [vmem:[%s809_s3 + $0x38] sm:$0xff]  }
   0x8   :  { %556 = vmatprep.subr.bf16.mxu0 %v627_v4  ;;  %v635_v24 = vld [vmem:[%s807_s1 + $0x48] sm:$0xff]   ;;  %v37_v28 = vmax.bf16 %v649_v15, %v29_v22  ;;  %v39_v29 = vmax.bf16 %v649_v15, %v31_v23  ;;  %v637_v31 = vld [vmem:[%s807_s1 + $0x40] sm:$0xff]   ;;  %v28_v33 = vld [vmem:[%s808_s0 + $0x18] sm:$0xff] }
   0x9   :  { %v490_v25 = vcombine.high %v32_v16, %v34_v17  ;;  %v636_v27 = vld [vmem:[%s807_s1 + $0x8] sm:$0xff]   ;;  %597 = vmatpush3.bf16.msra.mxu1 %v640_v18  ;;  %v491_v32 = vcombine.low %v33_v21, %v35_v26  ;;  %v642_v35 = vld [vmem:[%s809_s3 + $0x30] sm:$0xff]   ;;  %v639_v37 = vld [vmem:[%s807_s1] sm:$0xff]   ;;  %v36_v38 = vmax.bf16 %v649_v15, %v28_v33  ;;  %v489_v40 = vcombine.low %v32_v16, %v34_v17 }
   0xa   :  { %v30_v34 = vld [vmem:[%s808_s0 + $0x24] sm:$0xff]  ;;  %v494_v36 = vcombine.low %v37_v28, %v39_v29  ;;  %602 = vmatprep.subr.bf16.mxu1 %v641_v30  ;;  %v645_v45 = vld [vmem:[%s809_s3 + $0x18] sm:$0xff]   ;;  %v646_v46 = vld [vmem:[%s809_s3 + $0x10] sm:$0xff]  }
   0xb   :  { %557 = vmatpush3.bf16.msra.mxu0 %v628_v5  ;;  %260 = vmatprep.mubr.bf16.mxu0 %v490_v25  ;;  %v38_v39 = vmax.bf16 %v649_v15, %v30_v34  ;;  %v643_v43 = vld [vmem:[%s809_s3 + $0x28] sm:$0xff]   ;;  %v644_v44 = vld [vmem:[%s809_s3 + $0x20] sm:$0xff]  }
   0xc   :  { %558 = vmatprep.subr.bf16.mxu0 %v629_v6  ;;  %598 = vmatprep.mubr.msk.bf16.mxu1 %vm221_vm0, %v491_v32  ;;  %v647_v47 = vld [vmem:[%s809_s3 + $0x8] sm:$0xff]   ;;  %v648_v48 = vld [vmem:[%s809_s3] sm:$0xff]  }
   0xd   :  { %599 = vmatmul.mubr.msk.bf16.vlgmr.msra.gmra.mxu1 %vm221_vm0, %v494_v36  ;;  %v493_v41 = vcombine.high %v36_v38, %v38_v39  ;;  %v492_v42 = vcombine.low %v36_v38, %v38_v39  ;;  %v488_v53 = vld [vmem:[%s810_s2] ss:$0 sm:$0xff]  ;;  %v550_v18 = vld [vmem:[%s812_s5 + $0x8] sm:$0xff]  }
   0xe   :  { %603 = vmatpush3.bf16.msra.mxu1 %v641_v30  ;;  %v515_v17 = vld [vmem:[%s811_s4] ss:$0 sm:$0xff]  ;;  %v538_v22 = vunpack.c.l.bf16 %v550_v18  ;;  %v539_v23 = vunpack.c.h.bf16 %v550_v18 }
   0xf   :  { %559 = vmatpush3.bf16.msra.mxu0 %v630_v7  ;;  %604 = vmatprep.subr.bf16.mxu1 %v642_v35  ;;  %v533_v20 = vld [vmem:[%s812_s5] sm:$0xff]  }
  0x10   :  { %560 = vmatprep.subr.bf16.mxu0 %v631_v8  ;;  %v534_v26 = vunpack.c.l.bf16 %v533_v20  ;;  %v535_v28 = vunpack.c.h.bf16 %v533_v20 }
  0x12   :  { %605 = vmatpush3.bf16.msra.mxu1 %v642_v35 }
  0x13   :  { %561 = vmatpush3.bf16.msra.mxu0 %v632_v9  ;;  %606 = vmatprep.subr.bf16.mxu1 %v643_v43 }
  0x14   :  { %562 = vmatprep.subr.bf16.mxu0 %v633_v11 }
  0x16   :  { %607 = vmatpush3.bf16.msra.mxu1 %v643_v43 }
  0x17   :  { %563 = vmatpush3.bf16.msra.mxu0 %v634_v12  ;;  %608 = vmatprep.subr.bf16.mxu1 %v644_v44 }
  0x18   :  { %564 = vmatprep.subr.bf16.mxu0 %v635_v24 }
  0x1a   :  { %609 = vmatpush3.bf16.msra.mxu1 %v644_v44 }
  0x1b   :  { %565 = vmatpush3.bf16.msra.mxu0 %v636_v27  ;;  %610 = vmatprep.subr.bf16.mxu1 %v645_v45 }
  0x1c   :  { %566 = vmatprep.subr.bf16.mxu0 %v637_v31 }
  0x1e   :  { %611 = vmatpush3.bf16.msra.mxu1 %v645_v45 }
  0x1f   :  { %567 = vmatpush3.bf16.msra.mxu0 %v639_v37  ;;  %612 = vmatprep.subr.bf16.mxu1 %v646_v46 }
  0x22   :  { %261 = vmatmul.mubr.bf16.vlgmr.msra.gmra.mxu0 %v489_v40  ;;  %613 = vmatpush3.bf16.msra.mxu1 %v646_v46 }
  0x23   :  { %268 = vmatprep.mubr.bf16.mxu0 %v493_v41  ;;  %614 = vmatprep.subr.bf16.mxu1 %v647_v47 }
  0x26   :  { %615 = vmatpush3.bf16.msra.mxu1 %v647_v47 }
  0x27   :  { %616 = vmatprep.subr.bf16.mxu1 %v648_v48 }
  0x2a   :  { %269 = vmatmul.mubr.bf16.gmra.mxu0 %v492_v42  ;;  %617 = vmatpush3.bf16.msra.mxu1 %v648_v48 }
  0xcd   :  { %v600_v49 = vpop.f32.mrf.mxu1 }
  0xcf   :  { %v311_v51 = vpop.f32.mrf.mxu1 }
  0xd1   :  { %v601_v56 = vpop.f32.mrf.mxu1 }
  0xd3   :  { %v314_v61 = vpop.f32.mrf.mxu1 }
  0xe2   :  { %v568_v50 = vpop.f32.mrf.mxu0 }
  0xe4   :  { %v569_v52 = vpop.f32.mrf.mxu0 }
  0xe5   :  { %v570_v54 = vadd.f32 %v569_v52, %v568_v50 }
  0xe6   :  { %v571_v55 = vpop.f32.mrf.mxu0 }
  0xe7   :  { %v263_v57 = vadd.f32 %v570_v54, %v488_v53 }
  0xe8   :  { %v572_v58 = vpop.f32.mrf.mxu0 }
  0xe9   :  { %v573_v59 = vadd.f32 %v572_v58, %v571_v55  ;;  %v312_v62 = vadd.f32 %v311_v51, %v263_v57 }
  0xea   :  { %v574_v60 = vpop.f32.mrf.mxu0 }
  0xeb   :  { %v266_v63 = vadd.f32 %v573_v59, %v488_v53  ;;  %v326_v4 = vmax.f32 %v312_v62, 0.0 }
  0xec   :  { %v575_v0 = vpop.f32.mrf.mxu0 }
  0xed   :  { %v576_v1 = vadd.f32 %v575_v0, %v574_v60  ;;  %v315_v2 = vadd.f32 %v314_v61, %v266_v63 }
  0xee   :  { %v577_v3 = vpop.f32.mrf.mxu0 }
  0xef   :  { %v271_v5 = vadd.f32 %v576_v1, %v488_v53  ;;  %v327_v6 = vmax.f32 %v315_v2, 0.0 }
  0xf0   :  { %v578_v7 = vpop.f32.mrf.mxu0 }
  0xf1   :  { %v330_v8 = vpack.c.bf16 %v327_v6, %v326_v4  ;;  %v579_v9 = vadd.f32 %v578_v7, %v577_v3  ;;  %v320_v10 = vadd.f32 %v600_v49, %v271_v5 }
  0xf3   :  { %v274_v11 = vadd.f32 %v579_v9, %v488_v53  ;;  %618 = vmatprep.mubr.bf16.mxu1 %v330_v8  ;;  %v328_v13 = vmax.f32 %v320_v10, 0.0 }
  0xf5   :  { %v323_v12 = vadd.f32 %v601_v56, %v274_v11 }
  0xf7   :  { %v329_v14 = vmax.f32 %v323_v12, 0.0 }
  0xf9   :  { %v331_v15 = vpack.c.bf16 %v329_v14, %v328_v13 }
  0xfb   :  { %619 = vmatmul.mubr.bf16.vlgmr.msra.gmra.mxu1 %v331_v15 }
 0x1bb   :  { %v620_v16 = vpop.f32.mrf.mxu1 }
 0x1bc   :  { %v446_v21 = vadd.f32 %v620_v16, %v515_v17 }
 0x1bd   :  { %v437_v19 = vpop.f32.mrf.mxu1 }
 0x1be   :  { %v438_v25 = vadd.f32 %v515_v17, %v437_v19  ;;  %v462_v30 = vadd.f32 %v538_v22, %v446_v21 }
 0x1bf   :  { %v621_v24 = vpop.f32.mrf.mxu1 }
 0x1c0   :  { %v449_v27 = vadd.f32 %v621_v24, %v515_v17  ;;  %v460_v33 = vadd.f32 %v534_v26, %v438_v25 }
 0x1c1   :  { %v440_v29 = vpop.f32.mrf.mxu1 }
 0x1c2   :  { %v463_v31 = vadd.f32 %v539_v23, %v449_v27  ;;  %v441_v32 = vadd.f32 %v515_v17, %v440_v29 }
 0x1c4   :  { %v548_v34 = vpack.c.bf16 %v463_v31, %v462_v30  ;;  %v461_v35 = vadd.f32 %v535_v28, %v441_v32 }
 0x1c6   :  { %551 = vst [vmem:[%s813_s6 + $0x8] sm:$0xff] %v548_v34   ;;  %v543_v36 = vpack.c.bf16 %v461_v35, %v460_v33 }
 0x1c8   :  { %544 = vst [vmem:[%s813_s6] sm:$0xff] %v543_v36  }

</bundles_post_ra>
